<compile_context>
chip_gen: v7x
topology: tpu7x:2x2x1
jax: 0.10.0
libtpu: 0.0.40
codegen_flags: <defaults>
</compile_context>

<pallas_src>
import jax
import jax.numpy as jnp
from jax.experimental import pallas as pl
from jax.experimental.pallas import tpu as pltpu

# ----------------------------- sizes ---------------------------------------
B = 2                           # batch (demo)
OBS_DIM = 16                    # flat observation dim (MLP encoder input)
LATENT = 32                     # encoder output dim
HIDDEN = 32                     # head hidden dim
FEAT = 32                       # head.feature_dim
ACT_DIM = 2                     # action dim
EXTRA_DIM = 2 + 2 + ACT_DIM     # relative_pos(2) + last_act(2) + action(2) = 6
EXTRA_PAD = 8                   # extras zero-padded to a sublane-friendly 8
X_DIM = OBS_DIM + EXTRA_PAD     # 24: fused activation [obs | extras | pad]
NUM_Q = 2                       # twin critics
TWO_LAT = 2 * LATENT            # 64 (packing assumes LATENT == HIDDEN == FEAT)

# ---- lane-dense weight-slab layout: shape (96, 128), f32 -------------------
#   rows [ 0:64), lanes [ 0: 64)  = block_diag(W1L_1, W1L_2)   head L1 latent
#   rows [ 0:64), lanes [64:128)  = block_diag(W2_1,  W2_2)    head L2
#   rows [64:88), lanes [ 0: 64)  = [We_1 | We_2]  on x-rows 0..15 (obs), rest 0
#   rows [64:88), lanes [64:128)  = [W1E_1| W1E_2] on x-rows 16..21 (extras), rest 0
#   rows [88:96), lanes [64:128)  = vector block:
#       row 88: [be_1  | be_2 ]      row 91: [wf1ᵀ | 0   ]
#       row 89: [b1_1  | b1_2 ]      row 92: [0    | wf2ᵀ]
#       row 90: [b2_1  | b2_2 ]      row 93: [bf1, bf2, 0...]
SLAB_COLS = 128
R_SQ = 0                        # square block-diagonal weights
R_X = TWO_LAT                   # 64: blocks contracted against the activation
R_V = R_X + X_DIM               # 88: bias / fc-head vector block
SLAB_ROWS = R_V + 8             # 96


# ----------------------------- kernel --------------------------------------
def critic_kernel(x_ref, w_ref, q_ref):
    x = x_ref[...]                                         # (B, 24)
    w = w_ref[...]                                         # (96, 128) slab

    # Static, in-register slices of the slab (no extra DMAs).
    w1l = w[R_SQ:R_SQ + TWO_LAT, 0:TWO_LAT]                # (64,64) blkdiag
    w2 = w[R_SQ:R_SQ + TWO_LAT, TWO_LAT:SLAB_COLS]         # (64,64) blkdiag
    we = w[R_X:R_X + X_DIM, 0:TWO_LAT]                     # (24,64) encoder
    w1e = w[R_X:R_X + X_DIM, TWO_LAT:SLAB_COLS]            # (24,64) extras bypass
    vec = w[R_V:R_V + 8, TWO_LAT:SLAB_COLS]                # (8,64)  biases/fc
    be, b1, b2 = vec[0:1], vec[1:2], vec[2:3]              # each (1,64)
    wft = vec[3:5]                                         # (2,64) fc heads (T)
    bf = vec[5:6, 0:NUM_Q]                                 # (1,2)  fc biases

    # Both towers at once (columns 0..31 = tower 1, 32..63 = tower 2).
    # encoder:  latent = relu(obs @ We + be)   (zero x-rows 16..23 in `we`)
    latent = jnp.maximum(
        jnp.dot(x, we, preferred_element_type=jnp.float32) + be, 0.0)
    # head L1 on concat(latent, relative_pos, last_act, action):
    # split-matmul == concat-then-matmul (extras ride in x-rows 16..21 and hit
    # the matching rows of `w1e`; the padded rows/lanes are zero on both sides).
    h1 = jnp.maximum(
        jnp.dot(latent, w1l, preferred_element_type=jnp.float32)
        + jnp.dot(x, w1e, preferred_element_type=jnp.float32) + b1, 0.0)
    # head L2
    h2 = jnp.maximum(
        jnp.dot(h1, w2, preferred_element_type=jnp.float32) + b2, 0.0)
    # fc heads: q[:,0] = h2[:,0:32] @ wf1,  q[:,1] = h2[:,32:64] @ wf2
    q = jax.lax.dot_general(h2, wft, (((1,), (1,)), ((), ())),
                            preferred_element_type=jnp.float32)
    q_ref[...] = q + bf


# ----------------------------- wrapper --------------------------------------
def critic_forward(obs, last_act, relative_pos, action, slab):
    """Twin-Q forward.  Returns (q1, q2), each (B, 1)."""
    obs = jnp.asarray(obs, jnp.float32)
    last_act = jnp.asarray(last_act, jnp.float32).reshape(-1, 2)
    relative_pos = jnp.asarray(relative_pos, jnp.float32).reshape(-1, 2)
    action = jnp.asarray(action, jnp.float32)
    bsz = obs.shape[0]

    # torch: cat((latent, relative_pos, last_act), 1) then cat([., action], 1).
    # Fused activation: lanes 0..15 = obs, 16..17 = relative_pos,
    # 18..19 = last_act, 20..21 = action, 22..23 = zero padding.
    x = jnp.concatenate(
        [obs, relative_pos, last_act, action,
         jnp.zeros((bsz, EXTRA_PAD - EXTRA_DIM), jnp.float32)], axis=1)  # (B,24)

    flops = 2 * bsz * (2 * X_DIM * TWO_LAT + 2 * TWO_LAT * TWO_LAT
                       + TWO_LAT * NUM_Q)
    bytes_accessed = 4 * (x.size + SLAB_ROWS * SLAB_COLS + bsz * NUM_Q)

    vmem = pl.BlockSpec(memory_space=pltpu.MemorySpace.VMEM)
    q12 = pl.pallas_call(
        critic_kernel,
        out_shape=jax.ShapeDtypeStruct((bsz, NUM_Q), jnp.float32),
        in_specs=[vmem, vmem],
        out_specs=vmem,
        cost_estimate=pl.CostEstimate(flops=flops, transcendentals=0,
                                      bytes_accessed=bytes_accessed),
    )(x, slab)

    return q12[:, 0:1], q12[:, 1:2]


# ----------------------- deterministic param init --------------------------
def linear_init(key, fan_in, fan_out):
    """PyTorch nn.Linear-style uniform init U(-1/sqrt(fan_in), 1/sqrt(fan_in))."""
    kw, kb = jax.random.split(key)
    bound = 1.0 / jnp.sqrt(jnp.float32(fan_in))
    w = jax.random.uniform(kw, (fan_in, fan_out), jnp.float32, -bound, bound)
    b = jax.random.uniform(kb, (1, fan_out), jnp.float32, -bound, bound)
    return w, b


def make_tower(key):
    k_enc, k_h1, k_h2, k_fc = jax.random.split(key, 4)
    we, be = linear_init(k_enc, OBS_DIM, LATENT)            # encoder
    w1, b1 = linear_init(k_h1, LATENT + EXTRA_DIM, HIDDEN)  # head layer 1
    w2, b2 = linear_init(k_h2, HIDDEN, FEAT)                # head layer 2
    wf, bf = linear_init(k_fc, FEAT, 1)                     # fc head
    return dict(we=we, be=be, w1l=w1[:LATENT], w1e=w1[LATENT:], b1=b1,
                w2=w2, b2=b2, wf=wf, bf=bf)


def _block_diag(a, b):
    out = jnp.zeros((a.shape[0] + b.shape[0], a.shape[1] + b.shape[1]),
                    jnp.float32)
    out = out.at[:a.shape[0], :a.shape[1]].set(a)
    out = out.at[a.shape[0]:, a.shape[1]:].set(b)
    return out


def pack_slab(t1, t2):
    """Pack both critic towers into one lane-dense (96, 128) f32 slab."""
    slab = jnp.zeros((SLAB_ROWS, SLAB_COLS), jnp.float32)
    # square block-diagonal weights, rows [0:64)
    slab = slab.at[R_SQ:R_SQ + TWO_LAT, 0:TWO_LAT].set(
        _block_diag(t1["w1l"], t2["w1l"]))
    slab = slab.at[R_SQ:R_SQ + TWO_LAT, TWO_LAT:SLAB_COLS].set(
        _block_diag(t1["w2"], t2["w2"]))
    # activation-contracted blocks, rows [64:88)
    slab = slab.at[R_X:R_X + OBS_DIM, 0:TWO_LAT].set(
        jnp.concatenate([t1["we"], t2["we"]], axis=1))
    slab = slab.at[R_X + OBS_DIM:R_X + OBS_DIM + EXTRA_DIM,
                   TWO_LAT:SLAB_COLS].set(
        jnp.concatenate([t1["w1e"], t2["w1e"]], axis=1))
    # bias / fc-head vector block, rows [88:96), lanes [64:128)
    slab = slab.at[R_V + 0, TWO_LAT:SLAB_COLS].set(
        jnp.concatenate([t1["be"], t2["be"]], axis=1)[0])
    slab = slab.at[R_V + 1, TWO_LAT:SLAB_COLS].set(
        jnp.concatenate([t1["b1"], t2["b1"]], axis=1)[0])
    slab = slab.at[R_V + 2, TWO_LAT:SLAB_COLS].set(
        jnp.concatenate([t1["b2"], t2["b2"]], axis=1)[0])
    slab = slab.at[R_V + 3, TWO_LAT:TWO_LAT + FEAT].set(t1["wf"][:, 0])
    slab = slab.at[R_V + 4, TWO_LAT + FEAT:SLAB_COLS].set(t2["wf"][:, 0])
    slab = slab.at[R_V + 5, TWO_LAT:TWO_LAT + NUM_Q].set(
        jnp.array([t1["bf"][0, 0], t2["bf"][0, 0]], jnp.float32))
    return slab


def make_params(key, tie_towers=True):
    """tie_towers=True matches the torch module at construction
    (encoder2/head2 = deepcopy of encoder1/head1, fc2 independent)."""
    k1, k2, kf2 = jax.random.split(key, 3)
    t1 = make_tower(k1)
    if tie_towers:
        wf2, bf2 = linear_init(kf2, FEAT, 1)
        t2 = {**t1, "wf": wf2, "bf": bf2}
    else:
        t2 = make_tower(k2)     # fully diverged weights (post-training case)
    return pack_slab(t1, t2), (t1, t2)


# --------------------------- reference (plain JAX) --------------------------
def critic_ref(obs, extras, towers):
    def tower_q(t):
        lat = jnp.maximum(obs @ t["we"] + t["be"], 0.0)
        h1 = jnp.maximum(lat @ t["w1l"] + extras @ t["w1e"] + t["b1"], 0.0)
        h2 = jnp.maximum(h1 @ t["w2"] + t["b2"], 0.0)
        return h2 @ t["wf"] + t["bf"]
    t1, t2 = towers
    return tower_q(t1), tower_q(t2)


if __name__ == "__main__":
    key = jax.random.PRNGKey(0)
    k_obs, k_la, k_rp, k_act, k_par = jax.random.split(key, 5)

    obs = jax.random.normal(k_obs, (B, OBS_DIM), jnp.float32)
    last_act = jax.random.normal(k_la, (B, 2), jnp.float32)
    relative_pos = jax.random.normal(k_rp, (B, 2), jnp.float32)
    action = jax.random.normal(k_act, (B, ACT_DIM), jnp.float32)

    extras = jnp.concatenate([relative_pos.reshape(-1, 2),
                              last_act.reshape(-1, 2), action], axis=1)

    # 1) Module-faithful weights (encoder2/head2 are deepcopies, fc2 independent).
    slab, towers = make_params(k_par, tie_towers=True)
    q1, q2 = critic_forward(obs, last_act, relative_pos, action, slab)
    q1 = jax.block_until_ready(q1)
    q2 = jax.block_until_ready(q2)
    r1, r2 = critic_ref(obs, extras, towers)
    assert q1.shape == (B, 1) and q2.shape == (B, 1)
    assert jnp.allclose(q1, r1, atol=1e-5, rtol=1e-5)
    assert jnp.allclose(q2, r2, atol=1e-5, rtol=1e-5)

    # 2) Robustness: fully diverged twin-Q weights (as after TD3 training) —
    #    the block-diagonal fused kernel must still be exact.
    slab_d, towers_d = make_params(jax.random.PRNGKey(7), tie_towers=False)
    d1, d2 = critic_forward(obs, last_act, relative_pos, action, slab_d)
    d1 = jax.block_until_ready(d1)
    d2 = jax.block_until_ready(d2)
    e1, e2 = critic_ref(obs, extras, towers_d)
    assert jnp.allclose(d1, e1, atol=1e-5, rtol=1e-5)
    assert jnp.allclose(d2, e2, atol=1e-5, rtol=1e-5)

    print("KERNEL_OK")
</pallas_src>

<mosaic_0001>
module attributes {stable_mosaic.version = 11 : i64} {
  func.func @critic_kernel(%arg0: memref<2x24xf32, #tpu.memory_space<vmem>>, %arg1: memref<96x128xf32, #tpu.memory_space<vmem>>, %arg2: memref<2x2xf32, #tpu.memory_space<vmem>>) attributes {dimension_semantics = [], scalar_prefetch = 0 : i64, scratch_operands = 0 : i64, tpu.core_type = #tpu.core_type<tc>} {
    %c0 = arith.constant 0 : index
    %c0_0 = arith.constant 0 : index
    %0 = vector.load %arg0[%c0, %c0_0] : memref<2x24xf32, #tpu.memory_space<vmem>>, vector<2x24xf32>
    %c0_1 = arith.constant 0 : index
    %c0_2 = arith.constant 0 : index
    %1 = vector.load %arg1[%c0_1, %c0_2] : memref<96x128xf32, #tpu.memory_space<vmem>>, vector<96x128xf32>
    %2 = vector.extract_strided_slice %1 {offsets = [0, 0], sizes = [64, 64], strides = [1, 1]} : vector<96x128xf32> to vector<64x64xf32>
    %3 = vector.extract_strided_slice %1 {offsets = [0, 64], sizes = [64, 64], strides = [1, 1]} : vector<96x128xf32> to vector<64x64xf32>
    %4 = vector.extract_strided_slice %1 {offsets = [64, 0], sizes = [24, 64], strides = [1, 1]} : vector<96x128xf32> to vector<24x64xf32>
    %5 = vector.extract_strided_slice %1 {offsets = [64, 64], sizes = [24, 64], strides = [1, 1]} : vector<96x128xf32> to vector<24x64xf32>
    %6 = vector.extract_strided_slice %1 {offsets = [88, 64], sizes = [8, 64], strides = [1, 1]} : vector<96x128xf32> to vector<8x64xf32>
    %7 = vector.extract_strided_slice %6 {offsets = [0, 0], sizes = [1, 64], strides = [1, 1]} : vector<8x64xf32> to vector<1x64xf32>
    %8 = vector.extract_strided_slice %6 {offsets = [1, 0], sizes = [1, 64], strides = [1, 1]} : vector<8x64xf32> to vector<1x64xf32>
    %9 = vector.extract_strided_slice %6 {offsets = [2, 0], sizes = [1, 64], strides = [1, 1]} : vector<8x64xf32> to vector<1x64xf32>
    %10 = vector.extract_strided_slice %6 {offsets = [3, 0], sizes = [2, 64], strides = [1, 1]} : vector<8x64xf32> to vector<2x64xf32>
    %11 = vector.extract_strided_slice %6 {offsets = [5, 0], sizes = [1, 2], strides = [1, 1]} : vector<8x64xf32> to vector<1x2xf32>
    %cst = arith.constant dense<0.000000e+00> : vector<2x64xf32>
    %12 = tpu.matmul %0, %4, %cst {dimension_numbers = #tpu.dot_dimension_numbers<[1], [0], [0], [1], [0, 0, 1, 1], [], []>} : vector<2x24xf32>, vector<24x64xf32>, vector<2x64xf32> -> vector<2x64xf32>
    %13 = vector.broadcast %7 : vector<1x64xf32> to vector<2x64xf32>
    %14 = arith.addf %12, %13 : vector<2x64xf32>
    %cst_3 = arith.constant 0.000000e+00 : f32
    %15 = vector.broadcast %cst_3 : f32 to vector<2x64xf32>
    %16 = arith.maximumf %14, %15 : vector<2x64xf32>
    %cst_4 = arith.constant dense<0.000000e+00> : vector<2x64xf32>
    %17 = tpu.matmul %16, %2, %cst_4 {dimension_numbers = #tpu.dot_dimension_numbers<[1], [0], [0], [1], [0, 0, 1, 1], [], []>} : vector<2x64xf32>, vector<64x64xf32>, vector<2x64xf32> -> vector<2x64xf32>
    %cst_5 = arith.constant dense<0.000000e+00> : vector<2x64xf32>
    %18 = tpu.matmul %0, %5, %cst_5 {dimension_numbers = #tpu.dot_dimension_numbers<[1], [0], [0], [1], [0, 0, 1, 1], [], []>} : vector<2x24xf32>, vector<24x64xf32>, vector<2x64xf32> -> vector<2x64xf32>
    %19 = arith.addf %17, %18 : vector<2x64xf32>
    %20 = vector.broadcast %8 : vector<1x64xf32> to vector<2x64xf32>
    %21 = arith.addf %19, %20 : vector<2x64xf32>
    %cst_6 = arith.constant 0.000000e+00 : f32
    %22 = vector.broadcast %cst_6 : f32 to vector<2x64xf32>
    %23 = arith.maximumf %21, %22 : vector<2x64xf32>
    %cst_7 = arith.constant dense<0.000000e+00> : vector<2x64xf32>
    %24 = tpu.matmul %23, %3, %cst_7 {dimension_numbers = #tpu.dot_dimension_numbers<[1], [0], [0], [1], [0, 0, 1, 1], [], []>} : vector<2x64xf32>, vector<64x64xf32>, vector<2x64xf32> -> vector<2x64xf32>
    %25 = vector.broadcast %9 : vector<1x64xf32> to vector<2x64xf32>
    %26 = arith.addf %24, %25 : vector<2x64xf32>
    %cst_8 = arith.constant 0.000000e+00 : f32
    %27 = vector.broadcast %cst_8 : f32 to vector<2x64xf32>
    %28 = arith.maximumf %26, %27 : vector<2x64xf32>
    %cst_9 = arith.constant dense<0.000000e+00> : vector<2x2xf32>
    %29 = tpu.matmul %28, %10, %cst_9 {dimension_numbers = #tpu.dot_dimension_numbers<[1], [1], [0], [0], [0, 0, 1, 0], [], []>} : vector<2x64xf32>, vector<2x64xf32>, vector<2x2xf32> -> vector<2x2xf32>
    %30 = vector.broadcast %11 : vector<1x2xf32> to vector<2x2xf32>
    %31 = arith.addf %29, %30 : vector<2x2xf32>
    %c0_10 = arith.constant 0 : index
    %c0_11 = arith.constant 0 : index
    %32 = vector.load %arg2[%c0_10, %c0_11] : memref<2x2xf32, #tpu.memory_space<vmem>>, vector<2x2xf32>
    tpu.vector_store %arg2[%c0_10, %c0_11], %31 {strides = array<i32>} : memref<2x2xf32, #tpu.memory_space<vmem>>, vector<2x2xf32>,
    return
  }
}

</mosaic_0001>

<bundles_post_ra>
// kernel: tpu_custom_call.1
= control target key start
LH: loop header
LB: loop body
LE: loop exit
PB: predicated region body
PF: predicated region fallthrough
CT: control target
= control target key end

     0   :  { %7 = vsyncpa [#allocation3], 0  ;;  %s870_s0 = inlined_call_operand.hbm [shape: f32[2,24], index: 0, kind: input, shape index: {}]   ;;  %s871_s1 = inlined_call_operand.hbm [shape: f32[96,128], index: 1, kind: input, shape index: {}]   ;;  %s872_s2 = inlined_call_operand.hbm [shape: f32[2,2], index: 2, kind: output, shape index: {}]  }
   0x1   :  { %8 = vsyncpa [#allocation6], 0 }
   0x2   :  { %9 = vsyncpa [#allocation4], 0  ;;  %s750_s9 = smov [#allocation2]   ;;  %s751_s11 = smov [#allocation5]  }
   0x3   :  { %s16_s10 = sshll.u32 %s750_s9, 4  ;;  %s25_s12 = sshll.u32 %s751_s11, 4  ;;  %s17_s10 = int_to_ptr.vmem [resolvable:$true] %s16_s10  ;;  %s774_s12 = int_to_ptr.vmem [resolvable:$true] %s25_s12 }
   0x4   :  { %s678_s15 = scalar_lea.hbm %s870_s0, 32 }
   0x5   :  { %p679_p0 = scmp.ne.s32.totalorder %s870_s0, %s678_s15  ;;  %p682_p1 = scmp.lt.u32.totalorder %s678_s15, %s870_s0 }
   0x7   :  { %p684_p2 = pnand %p682_p1, %p679_p0 }
   0x9   :  { %687 = shalt.err (!%p684_p2)
}
   0xa   :  { %s688_s20 = scalar_lea.vmem %s17_s10, 32  ;;  %p693_p4 = scmp.lt.s32.totalorder %s17_s10, %s17_s10 }
   0xb   :  { %p689_p3 = scmp.ne.s32.totalorder %s17_s10, %s688_s20  ;;  %p694_p5 = scmp.lt.s32.totalorder %s688_s20, %s688_s20 }
   0xd   :  { %p695_p6 = por %p694_p5, %p693_p4 }
   0xf   :  { %p696_p7 = pnand %p695_p6, %p689_p3 }
  0x11   :  { %699 = shalt.err (!%p696_p7)
}
  0x12   :  { %19 = dma.hbm_to_vmem [thread:$0]  %s870_s0, 32, %s17_s10, [#allocation3]  }
  0x13   :  { %s700_s25 = scalar_lea.hbm %s871_s1, 1536 }
  0x14   :  { %p701_p8 = scmp.ne.s32.totalorder %s871_s1, %s700_s25  ;;  %p704_p9 = scmp.lt.u32.totalorder %s700_s25, %s871_s1 }
  0x16   :  { %p706_p10 = pnand %p704_p9, %p701_p8 }
  0x18   :  { %709 = shalt.err (!%p706_p10)
}
  0x19   :  { %s710_s30 = scalar_lea.vmem %s774_s12, 1536  ;;  %p715_p12 = scmp.lt.s32.totalorder %s774_s12, %s774_s12 }
  0x1a   :  { %p711_p11 = scmp.ne.s32.totalorder %s774_s12, %s710_s30  ;;  %p716_p13 = scmp.lt.s32.totalorder %s710_s30, %s710_s30 }
  0x1c   :  { %p717_p0 = por %p716_p13, %p715_p12 }
  0x1e   :  { %p718_p1 = pnand %p717_p0, %p711_p11 }
  0x20   :  { %721 = shalt.err (!%p718_p1)
}
  0x21   :  { %s752_s0 = smov 128   ;;  %s753_s3 = smov 8  }
  0x22   :  { %31 = dma.hbm_to_vmem [thread:$0]  %s871_s1, 1536, %s774_s12, [#allocation6], %s752_s0, %s752_s0, %s753_s3  }
  0x23   :  { %744 = dma.done.wait [#allocation3], 32  }
  0x24   :  { %745 = vsyncadd [#allocation3], 4294967264 }
  0x25   :  { %746 = dma.done.wait [#allocation6], 1536  }
  0x26   :  { %747 = vsyncadd [#allocation6], 4294965760  ;;  %v754_v0 = vmov 0.0|0.0   ;;  %vm755_vm0 = vmmov 0   ;;  %v756_v1 = vmov 0.0   ;;  %v51_v2 = vlaneseq  ;;  %v47_v5 = vld [vmem:[#allocation5 + $0x40] sm:$0xff] }
  0x27   :  { %614 = vmatprep.subr.bf16.mxu0 %v754_v0  ;;  %559 = vmatprep.mubr.msk.f32.mxu0 %vm755_vm0, %v756_v1  ;;  %v48_v6 = vld [vmem:[#allocation5 + $0x48] sm:$0xff]  ;;  %v49_v7 = vld [vmem:[#allocation5 + $0x50] sm:$0xff]  ;;  %v814_v10 = vld [vmem:[#allocation5 + $0x58] sm:$0xff]  ;;  %s757_s1 = smov 64   ;;  %vm59_vm1 = vcmask 195584   ;;  %vm216_vm2 = vcmask 523264  }
  0x28   :  { %617 = vmatprep.subr.bf16.mxu1 %v754_v0  ;;  %568 = vmatprep.mubr.msk.f32.mxu1 %vm755_vm0, %v756_v1  ;;  %v811_v3 = vshrl.u32 %v51_v2, 7  ;;  %v615_v8 = vpack.c.bf16 %v48_v6, %v47_v5  ;;  %v653_v9 = vpack.i.bf16 %v48_v6, %v47_v5  ;;  %v39_v11 = vld [vmem:[#allocation5] sm:$0xff]  ;;  %v40_v12 = vld [vmem:[#allocation5 + $0x8] sm:$0xff]  ;;  %v38_v14 = vld [vmem:[#allocation2] sm:$0x3]  ;;  %v419_v58 = vrot.slane %v814_v10, 3 }
  0x29   :  { %141 = vrot.lane.b32.xlu1 %v49_v7, %s757_s1  ;;  %v621_v15 = vpack.c.bf16 %v40_v12, %v39_v11  ;;  %v41_v16 = vld [vmem:[#allocation5 + $0x10] sm:$0xff]  ;;  %v42_v17 = vld [vmem:[#allocation5 + $0x18] sm:$0xff]  ;;  %v43_v19 = vld [vmem:[#allocation5 + $0x20] sm:$0xff]  ;;  %v658_v25 = vpack.i.bf16 %v40_v12, %v39_v11  ;;  %s758_s6 = smov [#allocation7]   ;;  %vm501_vm3 = vcmask 9216  }
  0x2a   :  { %v53_v4 = vsub.s32 0, %v811_v3  ;;  %616 = vmatpush3.bf16.msra.mxu0 %v615_v8  ;;  %654 = vrot.lane.b32.xlu0 %v653_v9, %s757_s1  ;;  %v624_v18 = vpack.c.bf16 %v42_v17, %v41_v16  ;;  %v44_v20 = vld [vmem:[#allocation5 + $0x28] sm:$0xff]  ;;  %v45_v22 = vld [vmem:[#allocation5 + $0x30] sm:$0xff]  ;;  %v46_v23 = vld [vmem:[#allocation5 + $0x38] sm:$0xff]  ;;  %v663_v26 = vpack.i.bf16 %v42_v17, %v41_v16  ;;  %v292_v29 = vsub.s32 1, %v811_v3  ;;  %s509_s7 = sshll.u32 %s758_s6, 4  ;;  %s510_s7 = int_to_ptr.vmem [resolvable:$true] %s509_s7 }
  0x2b   :  { %557 = vmatprep.subr.mxu0 %v756_v1  ;;  %v627_v21 = vpack.c.bf16 %v44_v20, %v43_v19  ;;  %v630_v24 = vpack.c.bf16 %v46_v23, %v45_v22  ;;  %v668_v27 = vpack.i.bf16 %v44_v20, %v43_v19  ;;  %v673_v28 = vpack.i.bf16 %v46_v23, %v45_v22  ;;  %s722_s8 = scalar_lea.vmem %s510_s7, 32  ;;  %p727_p3 = scmp.lt.s32.totalorder %s510_s7, %s510_s7 }
  0x2c   :  { %v54_v13 = vrot.slane %v814_v10, %v53_v4  ;;  %v293_v30 = vrot.slane %v814_v10, %v292_v29  ;;  %v302_v57 = vsub.s32 2, %v811_v3  ;;  %v416_v6 = vsub.s32 5, %v811_v3  ;;  %p723_p2 = scmp.ne.s32.totalorder %s510_s7, %s722_s8  ;;  %p728_p4 = scmp.lt.s32.totalorder %s722_s8, %s722_s8 }
  0x2d   :  { %659 = vrot.lane.b32.xlu1 %v658_v25, %s757_s1 }
  0x2e   :  { %558 = vmatpush3.msra.mxu0 %v49_v7  ;;  %56 = vrot.lane.b32.xlu0 %v54_v13, %s757_s1  ;;  %v303_v59 = vrot.slane %v814_v10, %v302_v57  ;;  %v417_v7 = vrot.slane %v814_v10, %v416_v6  ;;  %p729_p5 = por %p728_p4, %p727_p3 }
  0x2f   :  { %560 = vmatmul.mubr.msk.f32.vlgmr.msra.gmra.mrb[0].mxu0 %vm59_vm1, %v38_v14  ;;  %620 = vmatprep.subr.bf16.mxu0 %v754_v0 }
  0x30   :  { %622 = vmatpush3.bf16.msra.mxu0 %v621_v15  ;;  %587 = vmatprep.mubr.msk.f32.mxu0 %vm755_vm0, %v756_v1  ;;  %p730_p6 = pnand %p729_p5, %p723_p2 }
  0x31   :  { %623 = vmatprep.subr.bf16.mxu0 %v754_v0  ;;  %669 = vrot.lane.b32.xlu1 %v668_v27, %s757_s1 }
  0x32   :  { %664 = vrot.lane.b32.xlu0 %v663_v26, %s757_s1 }
  0x34   :  { %625 = vmatpush3.bf16.msra.mxu0 %v624_v18 }
  0x35   :  { %626 = vmatprep.subr.bf16.mxu0 %v754_v0  ;;  %295 = vrot.lane.b32.xlu1 %v293_v30, %s757_s1 }
  0x36   :  { %674 = vrot.lane.b32.xlu0 %v673_v28, %s757_s1 }
  0x38   :  { %628 = vmatpush3.bf16.msra.mxu0 %v627_v21 }
  0x39   :  { %629 = vmatprep.subr.bf16.mxu0 %v754_v0  ;;  %420 = vrot.lane.b32.xlu1 %v419_v58, %s757_s1 }
  0x3a   :  { %337 = vrot.lane.b32.xlu0 %v303_v59, %s757_s1 }
  0x3c   :  { %631 = vmatpush3.bf16.msra.mxu0 %v630_v24 }
  0x3d   :  { %609 = vmatprep.subr.mxu0 %v756_v1 }
  0x3e   :  { %423 = vrot.lane.b32.xlu0 %v417_v7, %s757_s1 }
  0x9b   :  { %v142_v35 = vpop.permute.xlu1 %141 }
  0x9c   :  { %v655_v31 = vpop.permute.xlu0 %654 }
  0x9d   :  { %v657_v32 = vunpack.i.h.bf16 %v655_v31  ;;  %v656_v33 = vunpack.i.l.bf16 %v655_v31 }
  0x9f   :  { %v618_v34 = vpack.c.bf16 %v657_v32, %v656_v33  ;;  %v660_v37 = vpop.permute.xlu1 %659 }
  0xa0   :  { %v57_v36 = vpop.permute.xlu0 %56  ;;  %v662_v39 = vunpack.i.h.bf16 %v660_v37  ;;  %v661_v40 = vunpack.i.l.bf16 %v660_v37 }
  0xa1   :  { %619 = vmatpush3.bf16.msra.mxu1 %v618_v34 }
  0xa2   :  { %566 = vmatprep.subr.mxu1 %v756_v1  ;;  %v633_v43 = vpack.c.bf16 %v662_v39, %v661_v40 }
  0xa3   :  { %v670_v44 = vpop.permute.xlu1 %669 }
  0xa4   :  { %v665_v38 = vpop.permute.xlu0 %664  ;;  %v672_v46 = vunpack.i.h.bf16 %v670_v44  ;;  %v671_v47 = vunpack.i.l.bf16 %v670_v44 }
  0xa5   :  { %567 = vmatpush3.msra.mxu1 %v142_v35  ;;  %v667_v41 = vunpack.i.h.bf16 %v665_v38  ;;  %v666_v42 = vunpack.i.l.bf16 %v665_v38 }
  0xa6   :  { %569 = vmatmul.mubr.msk.f32.vlgmr.msra.gmra.mrb[0].mxu1 %vm59_vm1, %v38_v14  ;;  %632 = vmatprep.subr.bf16.mxu1 %v754_v0  ;;  %v639_v52 = vpack.c.bf16 %v672_v46, %v671_v47 }
  0xa7   :  { %606 = vmatprep.mubr.msk.f32.mxu1 %vm755_vm0, %v756_v1  ;;  %v636_v45 = vpack.c.bf16 %v667_v41, %v666_v42  ;;  %634 = vmatpush3.bf16.msra.mxu1 %v633_v43  ;;  %v296_v62 = vpop.permute.xlu1 %295 }
  0xa8   :  { %635 = vmatprep.subr.bf16.mxu1 %v754_v0  ;;  %v675_v48 = vpop.permute.xlu0 %674 }
  0xa9   :  { %v677_v53 = vunpack.i.h.bf16 %v675_v48  ;;  %v676_v54 = vunpack.i.l.bf16 %v675_v48 }
  0xab   :  { %637 = vmatpush3.bf16.msra.mxu1 %v636_v45  ;;  %v642_v56 = vpack.c.bf16 %v677_v53, %v676_v54  ;;  %v421_v63 = vpop.permute.xlu1 %420 }
  0xac   :  { %638 = vmatprep.subr.bf16.mxu1 %v754_v0  ;;  %v338_v8 = vpop.permute.xlu0 %337 }
  0xaf   :  { %640 = vmatpush3.bf16.msra.mxu1 %v639_v52 }
  0xb0   :  { %641 = vmatprep.subr.bf16.mxu1 %v754_v0  ;;  %v424_v14 = vpop.permute.xlu0 %423 }
  0xb3   :  { %643 = vmatpush3.bf16.msra.mxu1 %v642_v56 }
 0x102   :  { %v129_v49 = vpop.f32.mrb[0].mxu0 }
 0x103   :  { %v130_v50 = vadd.f32 %v129_v49, %v57_v36  ;;  %v561_v51 = vpop.f32.mrb[1].mxu0 }
 0x105   :  { %v133_v55 = vmax.f32 %v130_v50, 0.0 }
 0x107   :  { %588 = vmatmul.mubr.msk.f32.vlgmr.msra.gmra.mrb[2].mxu0 %vm216_vm2, %v133_v55 }
 0x108   :  { %611 = vmatprep.mubr.msk.f32.mxu0 %vm755_vm0, %v756_v1  ;;  %610 = vmatpush3.xpose.msk.msra.mxu0 %vm216_vm2, %v421_v63 }
 0x179   :  { %v212_v60 = vpop.f32.mrb[0].mxu1 }
 0x17a   :  { %v570_v61 = vpop.f32.mrb[1].mxu1 }
 0x1da   :  { %v286_v1 = vpop.f32.mrb[2].mxu0 }
 0x1db   :  { %v287_v2 = vadd.f32 %v286_v1, %v212_v60  ;;  %v589_v0 = vpop.f32.mrb[3].mxu0 }
 0x1dd   :  { %v298_v4 = vadd.f32 %v296_v62, %v287_v2 }
 0x1df   :  { %v299_v5 = vmax.f32 %v298_v4, 0.0 }
 0x1e1   :  { %607 = vmatmul.mubr.msk.f32.vlgmr.msra.gmra.mrb[2].mxu1 %vm216_vm2, %v299_v5 }
 0x2b4   :  { %v409_v9 = vpop.f32.mrb[2].mxu1 }
 0x2b5   :  { %v410_v11 = vadd.f32 %v409_v9, %v338_v8  ;;  %v608_v12 = vpop.f32.mrb[3].mxu1 }
 0x2b7   :  { %v413_v13 = vmax.f32 %v410_v11, 0.0 }
 0x2b9   :  { %612 = vmatmul.mubr.msk.f32.vlgmr.msra.gmra.mrb[4].mxu0 %vm216_vm2, %v413_v13 }
 0x38c   :  { %v497_v15 = vpop.f32.mrb[4].mxu0 }
 0x38d   :  { %v498_v16 = vadd.f32 %v497_v15, %v424_v14  ;;  %v613_v17 = vpop.f32.mrb[5].mxu0 }
 0x38f   :  { %502 = vst.msk [vmem:[#allocation7] sm:$0x3] %vm501_vm3, %v498_v16 }
 0x390   :  { %733 = shalt.err (!%p730_p6)
}
 0x391   :  { %s734_s11 = scalar_lea.hbm %s872_s2, 32 }
 0x392   :  { %p735_p7 = scmp.ne.s32.totalorder %s872_s2, %s734_s11  ;;  %p738_p8 = scmp.lt.u32.totalorder %s734_s11, %s872_s2 }
 0x394   :  { %p740_p9 = pnand %p738_p8, %p735_p7 }
 0x396   :  { %743 = shalt.err (!%p740_p9)
}
 0x397   :  { %512 = dma.vmem_to_hbm [thread:$0]  %s510_s7, 32, %s872_s2, [#allocation4]  }
 0x398   :  { %748 = dma.done.wait [#allocation4], 32  }
 0x399   :  { %749 = vsyncadd [#allocation4], 4294967264 }
 0x39a   :  { %516 = vsyncpa [#allocation3], 1 }
 0x39b   :  { %517 = vsyncpa [#allocation6], 1 }
 0x39c   :  { %518 = vsyncpa [#allocation4], 1 }

</bundles_post_ra>
